<compile_context>
chip_gen: v6e
topology: v6e:2x2x1
jax: 0.10.0
libtpu: 0.0.40
codegen_flags: <defaults>
</compile_context>

<pallas_src>
import functools

import jax
import jax.numpy as jnp
from jax.experimental import pallas as pl
from jax.experimental.pallas import tpu as pltpu

D_IN, H1, H2, H3, D_OUT = 637, 128, 64, 32, 4


def _round_up(n, m):
    return ((n + m - 1) // m) * m


def _cdiv(a, b):
    return (a + b - 1) // b


def mlp_kernel(x_ref, w1_ref, b1_ref, w2_ref, b2_ref, w3_ref, b3_ref,
               w4_ref, b4_ref, o_ref):
    # x arrives as raw f32 (no wrapper-side pad/cast pass); cast to bf16 here so
    # the MXU runs single-pass bf16 matmuls with f32 accumulation.
    x = x_ref[...].astype(jnp.bfloat16)

    h = jnp.dot(x, w1_ref[...], preferred_element_type=jnp.float32) + b1_ref[...]
    h = jnp.maximum(h, 0.0).astype(jnp.bfloat16)   # ReLU (Dropout p=0.5 -> identity, eval)

    h = jnp.dot(h, w2_ref[...], preferred_element_type=jnp.float32) + b2_ref[...]
    h = jnp.maximum(h, 0.0).astype(jnp.bfloat16)   # ReLU (Dropout p=0.5 -> identity, eval)

    h = jnp.dot(h, w3_ref[...], preferred_element_type=jnp.float32) + b3_ref[...]
    h = jnp.maximum(h, 0.0).astype(jnp.bfloat16)   # ReLU (Dropout p=0.25 -> identity, eval)

    logits = jnp.dot(h, w4_ref[...], preferred_element_type=jnp.float32) + b4_ref[...]

    # Softmax over dim=1 (4 features); divide moved to the otherwise-idle EUP slot.
    m = jnp.max(logits, axis=1, keepdims=True)
    e = jnp.exp(logits - m)
    denom = jnp.sum(e, axis=1, keepdims=True)
    o_ref[...] = (e * pl.reciprocal(denom, approx=True)).astype(o_ref.dtype)
    # TODO(synk): if the 4-wide softmax/store tail shows up in profiles (>10% of
    # step time on v6e/v7x), switch to a lane-dense (4, tile) transposed output.


def _choose_tile(batch, tile_b):
    # Enough steps to keep tiles <= tile_b; force >= 2 steps once the batch is
    # large enough that splitting is free, so both v7x TensorCores stay busy.
    n_steps = max(_cdiv(batch, tile_b), 2 if batch > 256 else 1)
    tile = _round_up(_cdiv(batch, n_steps), 8)
    return min(tile, _round_up(batch, 8))


def pack_params(params):
    """One-time weight packing: bf16 weights (in,out), f32 biases (1,out)."""
    w1, b1, w2, b2, w3, b3, w4, b4 = params
    bf = lambda w: w.astype(jnp.bfloat16)
    return (bf(w1), b1, bf(w2), b2, bf(w3), b3, bf(w4), b4)


@functools.partial(jax.jit, static_argnames=("tile_b",))
def neural_net_forward(x, packed_params, *, tile_b=1024):
    """x: (B, 637) float32. packed_params: output of pack_params.
    Returns (B, 4) softmax probabilities (float32)."""
    B = x.shape[0]
    w1, b1, w2, b2, w3, b3, w4, b4 = packed_params

    # Only tiny batches (< one sublane group) need padding; everything else is
    # handled by Pallas' masked last block -- zero wrapper-side copies of x.
    B_run = max(B, 8)
    if B_run != B:
        x = jnp.pad(x, ((0, B_run - B), (0, 0)))

    tile = _choose_tile(B_run, tile_b)
    grid = (_cdiv(B_run, tile),)

    full = lambda shape: pl.BlockSpec(shape, lambda i: (0, 0))
    grid_spec = pltpu.PrefetchScalarGridSpec(
        num_scalar_prefetch=0,
        grid=grid,
        in_specs=[
            pl.BlockSpec((tile, D_IN), lambda i: (i, 0)),   # x streamed per tile
            full((D_IN, H1)), full((1, H1)),
            full((H1, H2)), full((1, H2)),
            full((H2, H3)), full((1, H3)),
            full((H3, D_OUT)), full((1, D_OUT)),
        ],
        out_specs=pl.BlockSpec((tile, D_OUT), lambda i: (i, 0)),
    )
    out = pl.pallas_call(
        mlp_kernel,
        out_shape=jax.ShapeDtypeStruct((B_run, D_OUT), jnp.float32),
        grid_spec=grid_spec,
        compiler_params=pltpu.CompilerParams(
            dimension_semantics=("parallel",)),
    )(x, w1, b1, w2, b2, w3, b3, w4, b4)
    return out[:B]


def reference_forward(x, params):
    """Pure-JAX reference (f32), eval-mode dropout = identity."""
    w1, b1, w2, b2, w3, b3, w4, b4 = params
    h = jnp.maximum(x @ w1 + b1, 0.0)
    h = jnp.maximum(h @ w2 + b2, 0.0)
    h = jnp.maximum(h @ w3 + b3, 0.0)
    return jax.nn.softmax(h @ w4 + b4, axis=1)


def init_params(key):
    """Deterministic PyTorch-style init: U(-1/sqrt(fan_in), 1/sqrt(fan_in))."""
    def linear(key, fan_in, fan_out):
        kw, kb = jax.random.split(key)
        bound = 1.0 / jnp.sqrt(float(fan_in))
        w = jax.random.uniform(kw, (fan_in, fan_out), jnp.float32, -bound, bound)
        b = jax.random.uniform(kb, (1, fan_out), jnp.float32, -bound, bound)
        return w, b

    k1, k2, k3, k4 = jax.random.split(key, 4)
    w1, b1 = linear(k1, D_IN, H1)
    w2, b2 = linear(k2, H1, H2)
    w3, b3 = linear(k3, H2, H3)
    w4, b4 = linear(k4, H3, D_OUT)
    return (w1, b1, w2, b2, w3, b3, w4, b4)


if __name__ == "__main__":
    key = jax.random.PRNGKey(0)
    k_params, k_x = jax.random.split(key)

    params = init_params(k_params)
    packed = pack_params(params)          # one-time bf16 packing (outside jit)
    x = jax.random.normal(k_x, (8, D_IN), jnp.float32)

    out = neural_net_forward(x, packed)
    out = jax.block_until_ready(out)

    # Sanity: shape, softmax rows sum to ~1, and agreement with f32 reference
    # (bf16 weights/activations + approx reciprocal => loose tolerance).
    ref = reference_forward(x, params)
    assert out.shape == (8, D_OUT)
    assert jnp.allclose(jnp.sum(out, axis=1), 1.0, atol=1e-2)
    assert jnp.allclose(out, ref, atol=3e-2)
    print("KERNEL_OK")
</pallas_src>

<mosaic_0001>
module attributes {stable_mosaic.version = 11 : i64} {
  func.func @mlp_kernel(%arg0: i32, %arg1: memref<8x637xf32, #tpu.memory_space<vmem>>, %arg2: memref<637x128xbf16, #tpu.memory_space<vmem>>, %arg3: memref<1x128xf32, #tpu.memory_space<vmem>>, %arg4: memref<128x64xbf16, #tpu.memory_space<vmem>>, %arg5: memref<1x64xf32, #tpu.memory_space<vmem>>, %arg6: memref<64x32xbf16, #tpu.memory_space<vmem>>, %arg7: memref<1x32xf32, #tpu.memory_space<vmem>>, %arg8: memref<32x4xbf16, #tpu.memory_space<vmem>>, %arg9: memref<1x4xf32, #tpu.memory_space<vmem>>, %arg10: memref<8x4xf32, #tpu.memory_space<vmem>>) attributes {dimension_semantics = [#tpu.dimension_semantics<parallel>], iteration_bounds = array<i64: 1>, scalar_prefetch = 0 : i64, scratch_operands = 0 : i64, tpu.core_type = #tpu.core_type<tc>, window_params = [{transform_indices = @transform_0, window_bounds = array<i64: 8, 637>}, {pipeline_mode = #tpu.pipeline_mode<synchronous>, transform_indices = @transform_1, window_bounds = array<i64: 637, 128>}, {pipeline_mode = #tpu.pipeline_mode<synchronous>, transform_indices = @transform_2, window_bounds = array<i64: 1, 128>}, {pipeline_mode = #tpu.pipeline_mode<synchronous>, transform_indices = @transform_3, window_bounds = array<i64: 128, 64>}, {pipeline_mode = #tpu.pipeline_mode<synchronous>, transform_indices = @transform_4, window_bounds = array<i64: 1, 64>}, {pipeline_mode = #tpu.pipeline_mode<synchronous>, transform_indices = @transform_5, window_bounds = array<i64: 64, 32>}, {pipeline_mode = #tpu.pipeline_mode<synchronous>, transform_indices = @transform_6, window_bounds = array<i64: 1, 32>}, {pipeline_mode = #tpu.pipeline_mode<synchronous>, transform_indices = @transform_7, window_bounds = array<i64: 32, 4>}, {pipeline_mode = #tpu.pipeline_mode<synchronous>, transform_indices = @transform_8, window_bounds = array<i64: 1, 4>}, {transform_indices = @transform_9, window_bounds = array<i64: 8, 4>}]} {
    %c0 = arith.constant 0 : index
    %c0_0 = arith.constant 0 : index
    %0 = vector.load %arg1[%c0, %c0_0] : memref<8x637xf32, #tpu.memory_space<vmem>>, vector<8x637xf32>
    %1 = arith.truncf %0 : vector<8x637xf32> to vector<8x637xbf16>
    %c0_1 = arith.constant 0 : index
    %c0_2 = arith.constant 0 : index
    %2 = vector.load %arg2[%c0_1, %c0_2] : memref<637x128xbf16, #tpu.memory_space<vmem>>, vector<637x128xbf16>
    %cst = arith.constant dense<0.000000e+00> : vector<8x128xf32>
    %3 = tpu.matmul %1, %2, %cst {dimension_numbers = #tpu.dot_dimension_numbers<[1], [0], [0], [1], [0, 0, 1, 1], [], []>} : vector<8x637xbf16>, vector<637x128xbf16>, vector<8x128xf32> -> vector<8x128xf32>
    %c0_3 = arith.constant 0 : index
    %c0_4 = arith.constant 0 : index
    %4 = vector.load %arg3[%c0_3, %c0_4] : memref<1x128xf32, #tpu.memory_space<vmem>>, vector<1x128xf32>
    %5 = vector.broadcast %4 : vector<1x128xf32> to vector<8x128xf32>
    %6 = arith.addf %3, %5 : vector<8x128xf32>
    %cst_5 = arith.constant 0.000000e+00 : f32
    %7 = vector.broadcast %cst_5 : f32 to vector<8x128xf32>
    %8 = arith.maximumf %6, %7 : vector<8x128xf32>
    %9 = arith.truncf %8 : vector<8x128xf32> to vector<8x128xbf16>
    %c0_6 = arith.constant 0 : index
    %c0_7 = arith.constant 0 : index
    %10 = vector.load %arg4[%c0_6, %c0_7] : memref<128x64xbf16, #tpu.memory_space<vmem>>, vector<128x64xbf16>
    %cst_8 = arith.constant dense<0.000000e+00> : vector<8x64xf32>
    %11 = tpu.matmul %9, %10, %cst_8 {dimension_numbers = #tpu.dot_dimension_numbers<[1], [0], [0], [1], [0, 0, 1, 1], [], []>} : vector<8x128xbf16>, vector<128x64xbf16>, vector<8x64xf32> -> vector<8x64xf32>
    %c0_9 = arith.constant 0 : index
    %c0_10 = arith.constant 0 : index
    %12 = vector.load %arg5[%c0_9, %c0_10] : memref<1x64xf32, #tpu.memory_space<vmem>>, vector<1x64xf32>
    %13 = vector.broadcast %12 : vector<1x64xf32> to vector<8x64xf32>
    %14 = arith.addf %11, %13 : vector<8x64xf32>
    %cst_11 = arith.constant 0.000000e+00 : f32
    %15 = vector.broadcast %cst_11 : f32 to vector<8x64xf32>
    %16 = arith.maximumf %14, %15 : vector<8x64xf32>
    %17 = arith.truncf %16 : vector<8x64xf32> to vector<8x64xbf16>
    %c0_12 = arith.constant 0 : index
    %c0_13 = arith.constant 0 : index
    %18 = vector.load %arg6[%c0_12, %c0_13] : memref<64x32xbf16, #tpu.memory_space<vmem>>, vector<64x32xbf16>
    %cst_14 = arith.constant dense<0.000000e+00> : vector<8x32xf32>
    %19 = tpu.matmul %17, %18, %cst_14 {dimension_numbers = #tpu.dot_dimension_numbers<[1], [0], [0], [1], [0, 0, 1, 1], [], []>} : vector<8x64xbf16>, vector<64x32xbf16>, vector<8x32xf32> -> vector<8x32xf32>
    %c0_15 = arith.constant 0 : index
    %c0_16 = arith.constant 0 : index
    %20 = vector.load %arg7[%c0_15, %c0_16] : memref<1x32xf32, #tpu.memory_space<vmem>>, vector<1x32xf32>
    %21 = vector.broadcast %20 : vector<1x32xf32> to vector<8x32xf32>
    %22 = arith.addf %19, %21 : vector<8x32xf32>
    %cst_17 = arith.constant 0.000000e+00 : f32
    %23 = vector.broadcast %cst_17 : f32 to vector<8x32xf32>
    %24 = arith.maximumf %22, %23 : vector<8x32xf32>
    %25 = arith.truncf %24 : vector<8x32xf32> to vector<8x32xbf16>
    %c0_18 = arith.constant 0 : index
    %c0_19 = arith.constant 0 : index
    %26 = vector.load %arg8[%c0_18, %c0_19] : memref<32x4xbf16, #tpu.memory_space<vmem>>, vector<32x4xbf16>
    %cst_20 = arith.constant dense<0.000000e+00> : vector<8x4xf32>
    %27 = tpu.matmul %25, %26, %cst_20 {dimension_numbers = #tpu.dot_dimension_numbers<[1], [0], [0], [1], [0, 0, 1, 1], [], []>} : vector<8x32xbf16>, vector<32x4xbf16>, vector<8x4xf32> -> vector<8x4xf32>
    %c0_21 = arith.constant 0 : index
    %c0_22 = arith.constant 0 : index
    %28 = vector.load %arg9[%c0_21, %c0_22] : memref<1x4xf32, #tpu.memory_space<vmem>>, vector<1x4xf32>
    %29 = vector.broadcast %28 : vector<1x4xf32> to vector<8x4xf32>
    %30 = arith.addf %27, %29 : vector<8x4xf32>
    %cst_23 = arith.constant dense<0xFF800000> : vector<8xf32>
    %31 = vector.multi_reduction <maximumf>, %30, %cst_23 [1] : vector<8x4xf32> to vector<8xf32>
    %32 = vector.shape_cast %31 : vector<8xf32> to vector<8x1xf32>
    %33 = vector.broadcast %32 : vector<8x1xf32> to vector<8x4xf32>
    %34 = arith.subf %30, %33 : vector<8x4xf32>
    %35 = math.exp %34 : vector<8x4xf32>
    %cst_24 = arith.constant dense<0.000000e+00> : vector<8xf32>
    %36 = vector.multi_reduction <add>, %35, %cst_24 [1] : vector<8x4xf32> to vector<8xf32>
    %37 = vector.shape_cast %36 : vector<8xf32> to vector<8x1xf32>
    %38 = tpu.reciprocal %37 {approx = true} : vector<8x1xf32> -> vector<8x1xf32>
    %39 = vector.broadcast %38 : vector<8x1xf32> to vector<8x4xf32>
    %40 = arith.mulf %35, %39 : vector<8x4xf32>
    %c0_25 = arith.constant 0 : index
    %c0_26 = arith.constant 0 : index
    %41 = vector.load %arg10[%c0_25, %c0_26] : memref<8x4xf32, #tpu.memory_space<vmem>>, vector<8x4xf32>
    tpu.vector_store %arg10[%c0_25, %c0_26], %40 {strides = array<i32>} : memref<8x4xf32, #tpu.memory_space<vmem>>, vector<8x4xf32>,
    return
  }
  func.func @transform_0(%arg0: i32) -> (i32, i32) {
    %c0_i32 = arith.constant 0 : i32
    %c0_i32_0 = arith.constant 0 : i32
    return %arg0, %c0_i32 : i32, i32
  }
  func.func @transform_1(%arg0: i32) -> (i32, i32) {
    %c0_i32 = arith.constant 0 : i32
    %c0_i32_0 = arith.constant 0 : i32
    %c0_i32_1 = arith.constant 0 : i32
    return %c0_i32, %c0_i32_0 : i32, i32
  }
  func.func @transform_2(%arg0: i32) -> (i32, i32) {
    %c0_i32 = arith.constant 0 : i32
    %c0_i32_0 = arith.constant 0 : i32
    %c0_i32_1 = arith.constant 0 : i32
    return %c0_i32, %c0_i32_0 : i32, i32
  }
  func.func @transform_3(%arg0: i32) -> (i32, i32) {
    %c0_i32 = arith.constant 0 : i32
    %c0_i32_0 = arith.constant 0 : i32
    %c0_i32_1 = arith.constant 0 : i32
    return %c0_i32, %c0_i32_0 : i32, i32
  }
  func.func @transform_4(%arg0: i32) -> (i32, i32) {
    %c0_i32 = arith.constant 0 : i32
    %c0_i32_0 = arith.constant 0 : i32
    %c0_i32_1 = arith.constant 0 : i32
    return %c0_i32, %c0_i32_0 : i32, i32
  }
  func.func @transform_5(%arg0: i32) -> (i32, i32) {
    %c0_i32 = arith.constant 0 : i32
    %c0_i32_0 = arith.constant 0 : i32
    %c0_i32_1 = arith.constant 0 : i32
    return %c0_i32, %c0_i32_0 : i32, i32
  }
  func.func @transform_6(%arg0: i32) -> (i32, i32) {
    %c0_i32 = arith.constant 0 : i32
    %c0_i32_0 = arith.constant 0 : i32
    %c0_i32_1 = arith.constant 0 : i32
    return %c0_i32, %c0_i32_0 : i32, i32
  }
  func.func @transform_7(%arg0: i32) -> (i32, i32) {
    %c0_i32 = arith.constant 0 : i32
    %c0_i32_0 = arith.constant 0 : i32
    %c0_i32_1 = arith.constant 0 : i32
    return %c0_i32, %c0_i32_0 : i32, i32
  }
  func.func @transform_8(%arg0: i32) -> (i32, i32) {
    %c0_i32 = arith.constant 0 : i32
    %c0_i32_0 = arith.constant 0 : i32
    %c0_i32_1 = arith.constant 0 : i32
    return %c0_i32, %c0_i32_0 : i32, i32
  }
  func.func @transform_9(%arg0: i32) -> (i32, i32) {
    %c0_i32 = arith.constant 0 : i32
    %c0_i32_0 = arith.constant 0 : i32
    return %arg0, %c0_i32 : i32, i32
  }
}

</mosaic_0001>

<bundles_post_ra>
// kernel: neural_net_forward.1
= control target key start
LH: loop header
LB: loop body
LE: loop exit
PB: predicated region body
PF: predicated region fallthrough
CT: control target
= control target key end

     0   :  { %14 = vsyncpa [#allocation3], 0  ;;  %s1076_s30 = smov [#allocation2]   ;;  %s1241_s0 = inlined_call_operand.vmem [shape: f32[8,637], index: 0, kind: input, shape index: {}]   ;;  %s1242_s1 = inlined_call_operand.hbm [shape: bf16[637,128], index: 1, kind: input, shape index: {}]   ;;  %s1243_s2 = inlined_call_operand.vmem [shape: f32[1,128], index: 2, kind: input, shape index: {}]   ;;  %s1244_s3 = inlined_call_operand.vmem [shape: bf16[128,64], index: 3, kind: input, shape index: {}]   ;;  %s1245_s4 = inlined_call_operand.vmem [shape: f32[1,64], index: 4, kind: input, shape index: {}]   ;;  %s1246_s5 = inlined_call_operand.vmem [shape: bf16[64,32], index: 5, kind: input, shape index: {}]   ;;  %s1247_s6 = inlined_call_operand.vmem [shape: f32[1,32], index: 6, kind: input, shape index: {}]   ;;  %s1248_s7 = inlined_call_operand.vmem [shape: bf16[32,4], index: 7, kind: input, shape index: {}]   ;;  %s1249_s8 = inlined_call_operand.vmem [shape: f32[1,4], index: 8, kind: input, shape index: {}]   ;;  %s1250_s9 = inlined_call_operand.vmem [shape: f32[8,4], index: 9, kind: output, shape index: {}]  }
   0x1   :  { %s22_s10 = sshll.u32 %s1076_s30, 4  ;;  %s23_s10 = int_to_ptr.vmem [resolvable:$true] %s22_s10 }
   0x2   :  { %s1062_s11 = scalar_lea.vmem %s23_s10, 5120  ;;  %p1067_p1 = scmp.lt.s32.totalorder %s23_s10, %s23_s10 }
   0x3   :  { %p1063_p0 = scmp.ne.s32.totalorder %s23_s10, %s1062_s11  ;;  %p1068_p2 = scmp.lt.s32.totalorder %s1062_s11, %s1062_s11 }
   0x5   :  { %p1069_p3 = por %p1068_p2, %p1067_p1 }
   0x7   :  { %p1070_p4 = pnand %p1069_p3, %p1063_p0 }
   0x9   :  { %1073 = shalt.err (!%p1070_p4)
}
   0xa   :  { %s1077_s12 = smov 64   ;;  %s1078_s13 = smov 4  }
   0xb   :  { %28 = dma.hbm_to_vmem [thread:$0]  %s1242_s1, 5120, %s23_s10, [#allocation3], %s1077_s12, %s1077_s12, %s1078_s13  }
   0xc   :  { %1074 = dma.done.wait [#allocation3], 5120  }
   0xd   :  { %1075 = vsyncadd [#allocation3], 4294962176  ;;  %v996_v0 = vld [vmem:[#allocation2 + $0x78] sm:$0xff]   ;;  %v1000_v4 = vld [vmem:[#allocation2 + $0x70] sm:$0xff]   ;;  %vm387_vm0 = vcmask 1045504   ;;  %vm388_vm1 = vcmask 1046528  }
   0xe   :  { %v997_v1 = vld [vmem:[#allocation2 + $0x38] sm:$0xff]   ;;  %860 = vmatprep.subr.bf16.mxu0 %v996_v0  ;;  %v1001_v5 = vld [vmem:[#allocation2 + $0x30] sm:$0xff]   ;;  %v1004_v8 = vld [vmem:[#allocation2 + $0x68] sm:$0xff]   ;;  %v1079_v30 = vmov 65535   ;;  %v1080_v37 = vmov 0.0   ;;  %vm1081_vm2 = vmmov 0  }
   0xf   :  { %v998_v2 = vld [vmem:[#allocation2 + $0xf8] sm:$0xff]   ;;  %861 = vmatpush3.bf16.msra.mxu0 %v997_v1  ;;  %v1002_v6 = vld [vmem:[#allocation2 + $0xf0] sm:$0xff]   ;;  %v1005_v9 = vld [vmem:[#allocation2 + $0x28] sm:$0xff]   ;;  %v389_v31 = vsel %vm387_vm0, 4294967295, %v1079_v30  ;;  %vm383_vm3 = vcmask 1022976   ;;  %vm668_vm4 = vcmask 523264  }
  0x10   :  { %v999_v3 = vld [vmem:[#allocation2 + $0xb8] sm:$0xff]   ;;  %882 = vmatprep.subr.bf16.mxu1 %v998_v2  ;;  %862 = vmatprep.subr.bf16.mxu0 %v1000_v4  ;;  %v1003_v7 = vld [vmem:[#allocation2 + $0xb0] sm:$0xff]   ;;  %v1006_v10 = vld [vmem:[#allocation2 + $0xe8] sm:$0xff]   ;;  %v390_v39 = vsel %vm388_vm1, %v389_v31, 0  ;;  %vm737_vm5 = vcmask 261120   ;;  %vm781_vm6 = vcmask 31744  }
  0x11   :  { %883 = vmatpush3.bf16.msra.mxu1 %v999_v3  ;;  %v1007_v11 = vld [vmem:[#allocation2 + $0xa8] sm:$0xff]   ;;  %v1008_v12 = vld [vmem:[#allocation2 + $0x60] sm:$0xff]   ;;  %v1012_v16 = vld [vmem:[#allocation2 + $0x58] sm:$0xff]  }
  0x12   :  { %884 = vmatprep.subr.bf16.mxu1 %v1002_v6  ;;  %v1009_v13 = vld [vmem:[#allocation2 + $0x20] sm:$0xff]   ;;  %v1013_v17 = vld [vmem:[#allocation2 + $0x18] sm:$0xff]   ;;  %v1016_v20 = vld [vmem:[#allocation2 + $0x50] sm:$0xff]  }
  0x13   :  { %863 = vmatpush3.bf16.msra.mxu0 %v1001_v5  ;;  %v1010_v14 = vld [vmem:[#allocation2 + $0xe0] sm:$0xff]   ;;  %v1014_v18 = vld [vmem:[#allocation2 + $0xd8] sm:$0xff]   ;;  %v1017_v21 = vld [vmem:[#allocation2 + $0x10] sm:$0xff]  }
  0x14   :  { %864 = vmatprep.subr.bf16.mxu0 %v1004_v8  ;;  %v1011_v15 = vld [vmem:[#allocation2 + $0xa0] sm:$0xff]   ;;  %v1015_v19 = vld [vmem:[#allocation2 + $0x98] sm:$0xff]   ;;  %v1018_v22 = vld [vmem:[#allocation2 + $0xd0] sm:$0xff]  }
  0x15   :  { %885 = vmatpush3.bf16.msra.mxu1 %v1003_v7  ;;  %v1019_v23 = vld [vmem:[#allocation2 + $0x90] sm:$0xff]   ;;  %v1020_v24 = vld [vmem:[#allocation2 + $0x48] sm:$0xff]   ;;  %v1024_v28 = vld [vmem:[#allocation2 + $0x40] sm:$0xff]  }
  0x16   :  { %886 = vmatprep.subr.bf16.mxu1 %v1006_v10  ;;  %v1021_v25 = vld [vmem:[#allocation2 + $0x8] sm:$0xff]   ;;  %v1025_v29 = vld [vmem:[#allocation2] sm:$0xff]   ;;  %v50_v38 = vld [vmem:[%s1241_s0 + $0x18] sm:$0xff] }
  0x17   :  { %865 = vmatpush3.bf16.msra.mxu0 %v1005_v9  ;;  %v1022_v26 = vld [vmem:[#allocation2 + $0xc8] sm:$0xff]   ;;  %v1026_v32 = vld [vmem:[#allocation2 + $0xc0] sm:$0xff]   ;;  %v55_v41 = vpack.c.bf16 %v50_v38, %v50_v38  ;;  %v1028_v42 = vld [vmem:[#allocation2 + $0x138] sm:$0x7f]  }
  0x18   :  { %866 = vmatprep.subr.bf16.mxu0 %v1008_v12  ;;  %v1023_v27 = vld [vmem:[#allocation2 + $0x88] sm:$0xff]   ;;  %v1027_v35 = vld [vmem:[#allocation2 + $0x80] sm:$0xff]   ;;  %v49_v43 = vld [vmem:[%s1241_s0 + $0x10] sm:$0xff]  ;;  %v392_v44 = vand.u32 %v1028_v42, %v390_v39 }
  0x19   :  { %887 = vmatpush3.bf16.msra.mxu1 %v1007_v11  ;;  %v48_v33 = vld [vmem:[%s1241_s0 + $0x8] sm:$0xff]  ;;  %v47_v36 = vld [vmem:[%s1241_s0] sm:$0xff]  ;;  %466 = vmatprep.mubr.bf16.mxu1 %v55_v41  ;;  %v54_v45 = vpack.c.bf16 %v49_v43, %v49_v43  ;;  %v1029_v46 = vld [vmem:[#allocation2 + $0x130] sm:$0xff]  }
  0x1a   :  { %888 = vmatprep.subr.bf16.mxu1 %v1010_v14  ;;  %v53_v34 = vpack.c.bf16 %v48_v33, %v48_v33  ;;  %v52_v40 = vpack.c.bf16 %v47_v36, %v47_v36  ;;  %v1030_v47 = vld [vmem:[#allocation2 + $0x128] sm:$0xff]   ;;  %v1031_v48 = vld [vmem:[#allocation2 + $0x120] sm:$0xff]   ;;  %v1032_v49 = vld [vmem:[#allocation2 + $0x118] sm:$0xff]  }
  0x1b   :  { %867 = vmatpush3.bf16.msra.mxu0 %v1009_v13  ;;  %v1033_v50 = vld [vmem:[#allocation2 + $0x110] sm:$0xff]   ;;  %v1034_v51 = vld [vmem:[#allocation2 + $0x108] sm:$0xff]   ;;  %v1035_v52 = vld [vmem:[#allocation2 + $0x100] sm:$0xff]  }
  0x1c   :  { %868 = vmatprep.subr.bf16.mxu0 %v1012_v16  ;;  %426 = vmatprep.mubr.bf16.mxu0 %v53_v34  ;;  %v51_v53 = vld [vmem:[%s1241_s0 + $0x20] sm:$0xff]  ;;  %v1036_v55 = vld [vmem:[%s1244_s3 + $0x38] sm:$0xff]   ;;  %v1037_v56 = vld [vmem:[%s1244_s3 + $0x30] sm:$0xff]  }
  0x1d   :  { %889 = vmatpush3.bf16.msra.mxu1 %v1011_v15  ;;  %v56_v54 = vpack.c.bf16 %v51_v53, %v51_v53  ;;  %v1038_v57 = vld [vmem:[%s1244_s3 + $0x28] sm:$0xff]   ;;  %v1039_v58 = vld [vmem:[%s1244_s3 + $0x20] sm:$0xff]   ;;  %v1040_v59 = vld [vmem:[%s1244_s3 + $0x18] sm:$0xff]  }
  0x1e   :  { %890 = vmatprep.subr.bf16.mxu1 %v1014_v18  ;;  %v1041_v60 = vld [vmem:[%s1244_s3 + $0x10] sm:$0xff]   ;;  %v1042_v61 = vld [vmem:[%s1244_s3 + $0x8] sm:$0xff]   ;;  %v1043_v62 = vld [vmem:[%s1244_s3] sm:$0xff]  }
  0x1f   :  { %869 = vmatpush3.bf16.msra.mxu0 %v1013_v17  ;;  %v1044_v63 = vld [vmem:[%s1246_s5 + $0x18] sm:$0xff]   ;;  %v1045_v0 = vld [vmem:[%s1246_s5 + $0x10] sm:$0xff]   ;;  %v799_v10 = vld [vmem:[%s1243_s2] ss:$0 sm:$0xff] }
  0x20   :  { %870 = vmatprep.subr.bf16.mxu0 %v1016_v20  ;;  %v850_v33 = vld [vmem:[%s1247_s6] ss:$0 sm:$0xff] }
  0x21   :  { %891 = vmatpush3.bf16.msra.mxu1 %v1015_v19  ;;  %v856_v41 = vld [vmem:[%s1249_s8] ss:$0 sm:$0xff] }
  0x22   :  { %892 = vmatprep.subr.bf16.mxu1 %v1018_v22  ;;  %v1047_v22 = vld [vmem:[%s1246_s5] sm:$0xff]  }
  0x23   :  { %871 = vmatpush3.bf16.msra.mxu0 %v1017_v21  ;;  %v1046_v21 = vld [vmem:[%s1246_s5 + $0x8] sm:$0xff]  }
  0x24   :  { %872 = vmatprep.subr.bf16.mxu0 %v1020_v24  ;;  %v841_v24 = vld [vmem:[%s1245_s4] ss:$0 sm:$0xff] }
  0x25   :  { %893 = vmatpush3.bf16.msra.mxu1 %v1019_v23  ;;  %v1048_v23 = vld [vmem:[%s1248_s7 + $0x8] sm:$0xff]  }
  0x26   :  { %894 = vmatprep.subr.bf16.mxu1 %v1022_v26 }
  0x27   :  { %873 = vmatpush3.bf16.msra.mxu0 %v1021_v25 }
  0x28   :  { %874 = vmatprep.subr.bf16.mxu0 %v1024_v28 }
  0x29   :  { %895 = vmatpush3.bf16.msra.mxu1 %v1023_v27 }
  0x2a   :  { %896 = vmatprep.subr.bf16.mxu1 %v1026_v32  ;;  %v1049_v32 = vld [vmem:[%s1248_s7] sm:$0xff]  }
  0x2b   :  { %875 = vmatpush3.bf16.msra.mxu0 %v1025_v29 }
  0x2c   :  { %930 = vmatprep.subr.bf16.mxu0 %v1080_v37 }
  0x2d   :  { %897 = vmatpush3.bf16.msra.mxu1 %v1027_v35 }
  0x2e   :  { %427 = vmatmul.mubr.bf16.vlgmr.msra.gmra.mxu0 %v52_v40  ;;  %950 = vmatprep.subr.bf16.mxu1 %v1080_v37 }
  0x2f   :  { %946 = vmatprep.mubr.msk.bf16.mxu0 %vm1081_vm2, %v1080_v37  ;;  %931 = vmatpush3.bf16.msra.mxu0 %v392_v44 }
  0x30   :  { %467 = vmatmul.mubr.bf16.vlgmr.msra.gmra.mxu1 %v54_v45  ;;  %932 = vmatprep.subr.bf16.mxu0 %v1080_v37 }
  0x31   :  { %966 = vmatprep.mubr.msk.bf16.mxu1 %vm1081_vm2, %v1080_v37  ;;  %951 = vmatpush3.bf16.msra.mxu1 %v1036_v55 }
  0x32   :  { %952 = vmatprep.subr.bf16.mxu1 %v1080_v37 }
  0x33   :  { %933 = vmatpush3.bf16.msra.mxu0 %v1029_v46 }
  0x34   :  { %934 = vmatprep.subr.bf16.mxu0 %v1080_v37 }
  0x35   :  { %953 = vmatpush3.bf16.msra.mxu1 %v1037_v56 }
  0x36   :  { %954 = vmatprep.subr.bf16.mxu1 %v1080_v37 }
  0x37   :  { %935 = vmatpush3.bf16.msra.mxu0 %v1030_v47 }
  0x38   :  { %936 = vmatprep.subr.bf16.mxu0 %v1080_v37 }
  0x39   :  { %955 = vmatpush3.bf16.msra.mxu1 %v1038_v57 }
  0x3a   :  { %956 = vmatprep.subr.bf16.mxu1 %v1080_v37 }
  0x3b   :  { %937 = vmatpush3.bf16.msra.mxu0 %v1031_v48 }
  0x3c   :  { %938 = vmatprep.subr.bf16.mxu0 %v1080_v37 }
  0x3d   :  { %957 = vmatpush3.bf16.msra.mxu1 %v1039_v58 }
  0x3e   :  { %958 = vmatprep.subr.bf16.mxu1 %v1080_v37 }
  0x3f   :  { %939 = vmatpush3.bf16.msra.mxu0 %v1032_v49 }
  0x40   :  { %940 = vmatprep.subr.bf16.mxu0 %v1080_v37 }
  0x41   :  { %959 = vmatpush3.bf16.msra.mxu1 %v1040_v59 }
  0x42   :  { %960 = vmatprep.subr.bf16.mxu1 %v1080_v37 }
  0x43   :  { %941 = vmatpush3.bf16.msra.mxu0 %v1033_v50 }
  0x44   :  { %942 = vmatprep.subr.bf16.mxu0 %v1080_v37 }
  0x45   :  { %961 = vmatpush3.bf16.msra.mxu1 %v1041_v60 }
  0x46   :  { %962 = vmatprep.subr.bf16.mxu1 %v1080_v37 }
  0x47   :  { %943 = vmatpush3.bf16.msra.mxu0 %v1034_v51 }
  0x48   :  { %944 = vmatprep.subr.bf16.mxu0 %v1080_v37 }
  0x49   :  { %963 = vmatpush3.bf16.msra.mxu1 %v1042_v61 }
  0x4a   :  { %964 = vmatprep.subr.bf16.mxu1 %v1080_v37 }
  0x4b   :  { %945 = vmatpush3.bf16.msra.mxu0 %v1035_v52 }
  0x4c   :  { %970 = vmatprep.subr.bf16.mxu0 %v1080_v37 }
  0x4d   :  { %965 = vmatpush3.bf16.msra.mxu1 %v1043_v62 }
  0x4e   :  { %947 = vmatmul.mubr.msk.bf16.vlgmr.msra.gmra.mxu0 %vm383_vm3, %v56_v54  ;;  %982 = vmatprep.subr.bf16.mxu1 %v1080_v37 }
  0x4f   :  { %978 = vmatprep.mubr.msk.bf16.mxu0 %vm1081_vm2, %v1080_v37  ;;  %971 = vmatpush3.bf16.msra.mxu0 %v1044_v63 }
  0x50   :  { %972 = vmatprep.subr.bf16.mxu0 %v1080_v37 }
  0x53   :  { %973 = vmatpush3.bf16.msra.mxu0 %v1045_v0 }
  0x54   :  { %974 = vmatprep.subr.bf16.mxu0 %v1080_v37 }
  0x57   :  { %975 = vmatpush3.bf16.msra.mxu0 %v1046_v21 }
  0x58   :  { %976 = vmatprep.subr.bf16.mxu0 %v1080_v37 }
  0x5b   :  { %977 = vmatpush3.bf16.msra.mxu0 %v1047_v22 }
  0xee   :  { %v876_v1 = vpop.f32.mrf.mxu0 }
  0xf0   :  { %v877_v2 = vpop.f32.mrf.mxu0  ;;  %v898_v3 = vpop.f32.mrf.mxu1 }
  0xf1   :  { %v878_v9 = vadd.f32 %v877_v2, %v876_v1 }
  0xf2   :  { %v879_v4 = vpop.f32.mrf.mxu0  ;;  %v899_v5 = vpop.f32.mrf.mxu1 }
  0xf3   :  { %v429_v11 = vadd.f32 %v878_v9, %v799_v10  ;;  %v900_v12 = vadd.f32 %v899_v5, %v898_v3 }
  0xf4   :  { %v880_v6 = vpop.f32.mrf.mxu0  ;;  %v901_v7 = vpop.f32.mrf.mxu1 }
  0xf5   :  { %v469_v13 = vadd.f32 %v900_v12, %v429_v11 }
  0xf6   :  { %v902_v8 = vpop.f32.mrf.mxu1 }
 0x10e   :  { %v508_v14 = vpop.f32.mrf.mxu0 }
 0x10f   :  { %v509_v15 = vadd.f32 %v508_v14, %v469_v13 }
 0x110   :  { %v948_v16 = vpop.f32.mrf.mxu0 }
 0x111   :  { %v514_v17 = vmax.f32 %v509_v15, 0.0 }
 0x112   :  { %v511_v18 = vpop.f32.mrf.mxu0 }
 0x113   :  { %v515_v19 = vpack.c.bf16 %v514_v17, %v514_v17 }
 0x114   :  { %v949_v20 = vpop.f32.mrf.mxu0 }
 0x115   :  { %967 = vmatmul.mubr.bf16.vlgmr.msra.gmra.mxu1 %v515_v19 }
 0x116   :  { %986 = vmatprep.mubr.msk.bf16.mxu1 %vm1081_vm2, %v1080_v37  ;;  %983 = vmatpush3.bf16.msra.mxu1 %v1048_v23 }
 0x117   :  { %984 = vmatprep.subr.bf16.mxu1 %v1080_v37 }
 0x11a   :  { %985 = vmatpush3.bf16.msra.mxu1 %v1049_v32 }
 0x1d5   :  { %v621_v25 = vpop.f32.mrf.mxu1 }
 0x1d6   :  { %v622_v26 = vadd.f32 %v841_v24, %v621_v25 }
 0x1d7   :  { %v968_v27 = vpop.f32.mrf.mxu1 }
 0x1d8   :  { %v627_v28 = vmax.f32 %v622_v26, 0.0 }
 0x1d9   :  { %v624_v29 = vpop.f32.mrf.mxu1 }
 0x1da   :  { %v628_v30 = vpack.c.bf16 %v627_v28, %v627_v28 }
 0x1db   :  { %v969_v31 = vpop.f32.mrf.mxu1 }
 0x1dc   :  { %979 = vmatmul.mubr.msk.bf16.vlgmr.msra.gmra.mxu0 %vm668_vm4, %v628_v30 }
 0x29c   :  { %v706_v34 = vpop.f32.mrf.mxu0 }
 0x29d   :  { %v707_v35 = vadd.f32 %v850_v33, %v706_v34 }
 0x29e   :  { %v980_v36 = vpop.f32.mrf.mxu0 }
 0x29f   :  { %v712_v37 = vmax.f32 %v707_v35, 0.0 }
 0x2a0   :  { %v709_v38 = vpop.f32.mrf.mxu0 }
 0x2a1   :  { %v713_v39 = vpack.c.bf16 %v712_v37, %v712_v37 }
 0x2a2   :  { %v981_v40 = vpop.f32.mrf.mxu0 }
 0x2a3   :  { %987 = vmatmul.mubr.msk.bf16.vlgmr.msra.gmra.mxu1 %vm737_vm5, %v713_v39 }
 0x363   :  { %v775_v42 = vpop.f32.mrf.mxu1 }
 0x364   :  { %v776_v43 = vadd.f32 %v856_v41, %v775_v42 }
 0x365   :  { %v988_v44 = vpop.f32.mrf.mxu1 }
 0x366   :  { %v782_v45 = vsel %vm781_vm6, %v776_v43, -inf }
 0x367   :  { %783 = vmax.xlane.f32.xlu0 %v782_v45  ;;  %v778_v46 = vpop.f32.mrf.mxu1 }
 0x369   :  { %v989_v47 = vpop.f32.mrf.mxu1 }
 0x3f0   :  { %v784_v48 = vpop.xlane.xlu0 %783 }
 0x3f1   :  { %v785_v49 = vsub.f32 %v776_v43, %v784_v48 }
 0x3f3   :  { %v786_v50 = vmul.f32 1.442695, %v785_v49 }
 0x3f5   :  { %1050 = vpow2.f32 %v786_v50 }
 0x402   :  { %v1051_v51 = vpop.eup %1050 }
 0x403   :  { %v788_v52 = vsel %vm781_vm6, %v1051_v51, 0.0 }
 0x404   :  { %789 = vadd.xlane.f32.xlu0 %v788_v52 }
 0x48d   :  { %v790_v53 = vpop.xlane.xlu0 %789 }
 0x48e   :  { %1052 = vrcp.f32 %v790_v53 }
 0x49b   :  { %v1053_v54 = vpop.eup %1052 }
 0x49c   :  { %v792_v55 = vmul.f32 %v1053_v54, %v1051_v51 }
 0x49e   :  { %793 = vst.msk [vmem:[%s1250_s9] sm:$0xff] %vm781_vm6, %v792_v55 }
 0x49f   :  { %798 = vsyncpa [#allocation3], 1 }

</bundles_post_ra>
